<compile_context>
chip_gen: v7x
topology: tpu7x:2x2x1
jax: 0.10.0
libtpu: 0.0.40
codegen_flags: <defaults>
</compile_context>

<pallas_src>
import jax
import jax.numpy as jnp
from jax import lax
from jax.experimental import pallas as pl
from jax.experimental.pallas import tpu as pltpu


def _round_up(x, m):
    return ((x + m - 1) // m) * m


def _conv3d_mm_kernel(w_ref, p_ref, o_ref):
    # w_ref: (Cout, K)   -- resident flattened weights, K = Cin*KD*KH*KW
    # p_ref: (K, TM)     -- im2col patches for this (batch, spatial-tile)
    # o_ref: (Cout, TM)  -- lane-dense output tile (TM is a multiple of 128)
    o_ref[...] = jnp.dot(
        w_ref[...], p_ref[...], preferred_element_type=jnp.float32
    ).astype(o_ref.dtype)


def conv3d_stride_matmul(patches, w_flat, *, tm):
    """patches: (N, K, M_pad), w_flat: (Cout, K) -> (N, Cout, M_pad)."""
    N, K, M_pad = patches.shape
    Cout = w_flat.shape[0]
    grid = (N, M_pad // tm)

    flops = 2 * N * Cout * K * M_pad
    bytes_accessed = 4 * (N * K * M_pad + Cout * K + N * Cout * M_pad)

    return pl.pallas_call(
        _conv3d_mm_kernel,
        out_shape=jax.ShapeDtypeStruct((N, Cout, M_pad), patches.dtype),
        grid_spec=pltpu.PrefetchScalarGridSpec(
            num_scalar_prefetch=0,
            grid=grid,
            in_specs=[
                pl.BlockSpec((Cout, K), lambda n, m: (0, 0)),
                pl.BlockSpec((None, K, tm), lambda n, m: (n, 0, m)),
            ],
            out_specs=pl.BlockSpec((None, Cout, tm), lambda n, m: (n, 0, m)),
        ),
        compiler_params=pltpu.CompilerParams(
            dimension_semantics=("parallel", "parallel")),
        cost_estimate=pl.CostEstimate(
            flops=flops, transcendentals=0, bytes_accessed=bytes_accessed),
    )(w_flat, patches)


def down_sampling_forward(x, weight, *, stride=2, padding=1,
                          dropout_rate=None, tm_max=2048):
    """Forward pass of DownSampling (Conv3d k=3, s=2, p=1, bias=False).

    x      : (N, Cin, D, H, W)        channels-first, like PyTorch
    weight : (Cout, Cin, KD, KH, KW)
    returns: (N, Cout, Do, Ho, Wo)
    """
    N, Cin, D, H, W = x.shape
    Cout, Cin_w, KD, KH, KW = weight.shape
    assert Cin == Cin_w

    Do = (D + 2 * padding - KD) // stride + 1
    Ho = (H + 2 * padding - KH) // stride + 1
    Wo = (W + 2 * padding - KW) // stride + 1
    M = Do * Ho * Wo
    K = Cin * KD * KH * KW

    xp = jnp.pad(x, ((0, 0), (0, 0),
                     (padding, padding), (padding, padding), (padding, padding)))

    # --- im2col tap gather (glue: pure data movement, channels-first) -------
    taps = []
    for kd in range(KD):
        for kh in range(KH):
            for kw in range(KW):
                sl = lax.slice(
                    xp,
                    (0, 0, kd, kh, kw),
                    (N, Cin,
                     kd + stride * (Do - 1) + 1,
                     kh + stride * (Ho - 1) + 1,
                     kw + stride * (Wo - 1) + 1),
                    (1, 1, stride, stride, stride))
                taps.append(sl.reshape(N, Cin, 1, M))
    # (N, Cin, KD*KH*KW, M) -> (N, K, M); channel-major over taps, matching
    # weight.reshape(Cout, K) so a single matmul implements the conv.
    patches = jnp.concatenate(taps, axis=2).reshape(N, K, M)
    w_flat = weight.reshape(Cout, K)

    # --- lane-dense tiling over the flattened output-spatial axis -----------
    tm = min(tm_max, _round_up(M, 128))
    M_pad = _round_up(M, tm)
    if M_pad != M:
        patches = jnp.pad(patches, ((0, 0), (0, 0), (0, M_pad - M)))

    y = conv3d_stride_matmul(patches, w_flat, tm=tm)
    y = y[:, :, :M].reshape(N, Cout, Do, Ho, Wo)

    if dropout_rate is not None:
        # TODO(synk): Dropout3d is identity at inference (and when
        # dropout_rate=None); training-mode channel dropout would use
        # pltpu.prng_seed / pltpu.stateful_bernoulli inside the kernel.
        pass
    return y


if __name__ == "__main__":
    key = jax.random.PRNGKey(0)
    k_x, k_w = jax.random.split(key, 2)

    N, Cin, Cout = 2, 4, 8
    D = H = W = 16           # output spatial 8x8x8 -> M = 512 (lane-dense)

    x = jax.random.normal(k_x, (N, Cin, D, H, W), dtype=jnp.float32)
    weight = jax.random.normal(k_w, (Cout, Cin, 3, 3, 3), dtype=jnp.float32) * 0.1

    out = down_sampling_forward(x, weight)
    out = jax.block_until_ready(out)

    # pure-JAX reference: strided Conv3d, padding 1, no bias
    ref = lax.conv_general_dilated(
        x, weight, window_strides=(2, 2, 2),
        padding=((1, 1), (1, 1), (1, 1)),
        dimension_numbers=("NCDHW", "OIDHW", "NCDHW"),
        precision=lax.Precision.HIGHEST)

    assert out.shape == (N, Cout, D // 2, H // 2, W // 2), out.shape
    assert jnp.allclose(out, ref, atol=1e-3, rtol=1e-3), \
        float(jnp.max(jnp.abs(out - ref)))

    print("KERNEL_OK")
</pallas_src>

<mosaic_0001>
module attributes {stable_mosaic.version = 11 : i64} {
  func.func @_conv3d_mm_kernel(%arg0: i32, %arg1: i32, %arg2: memref<8x108xf32, #tpu.memory_space<vmem>>, %arg3: memref<1x108x512xf32, #tpu.memory_space<vmem>>, %arg4: memref<1x8x512xf32, #tpu.memory_space<vmem>>) attributes {dimension_semantics = [#tpu.dimension_semantics<parallel>, #tpu.dimension_semantics<parallel>], iteration_bounds = array<i64: 2, 1>, scalar_prefetch = 0 : i64, scratch_operands = 0 : i64, tpu.core_type = #tpu.core_type<tc>, window_params = [{pipeline_mode = #tpu.pipeline_mode<synchronous>, transform_indices = @transform_0, window_bounds = array<i64: 8, 108>}, {transform_indices = @transform_1, window_bounds = array<i64: 1, 108, 512>}, {transform_indices = @transform_2, window_bounds = array<i64: 1, 8, 512>}]} {
    %c0 = arith.constant 0 : index
    %c0_0 = arith.constant 0 : index
    %0 = vector.load %arg2[%c0, %c0_0] : memref<8x108xf32, #tpu.memory_space<vmem>>, vector<8x108xf32>
    %c0_1 = arith.constant 0 : index
    %c0_2 = arith.constant 0 : index
    %c0_3 = arith.constant 0 : index
    %1 = vector.load %arg3[%c0_1, %c0_2, %c0_3] : memref<1x108x512xf32, #tpu.memory_space<vmem>>, vector<1x108x512xf32>
    %2 = vector.shape_cast %1 : vector<1x108x512xf32> to vector<108x512xf32>
    %cst = arith.constant dense<0.000000e+00> : vector<8x512xf32>
    %3 = tpu.matmul %0, %2, %cst {dimension_numbers = #tpu.dot_dimension_numbers<[1], [0], [0], [1], [0, 0, 1, 1], [], []>} : vector<8x108xf32>, vector<108x512xf32>, vector<8x512xf32> -> vector<8x512xf32>
    %c0_4 = arith.constant 0 : index
    %c0_5 = arith.constant 0 : index
    %c0_6 = arith.constant 0 : index
    %4 = vector.load %arg4[%c0_4, %c0_5, %c0_6] : memref<1x8x512xf32, #tpu.memory_space<vmem>>, vector<1x8x512xf32>
    %5 = vector.shape_cast %4 : vector<1x8x512xf32> to vector<8x512xf32>
    %6 = vector.shape_cast %3 : vector<8x512xf32> to vector<1x8x512xf32>
    tpu.vector_store %arg4[%c0_4, %c0_5, %c0_6], %6 {strides = array<i32>} : memref<1x8x512xf32, #tpu.memory_space<vmem>>, vector<1x8x512xf32>,
    return
  }
  func.func @transform_0(%arg0: i32, %arg1: i32) -> (i32, i32) {
    %c0_i32 = arith.constant 0 : i32
    %c0_i32_0 = arith.constant 0 : i32
    %c0_i32_1 = arith.constant 0 : i32
    return %c0_i32, %c0_i32_0 : i32, i32
  }
  func.func @transform_1(%arg0: i32, %arg1: i32) -> (i32, i32, i32) {
    %c0_i32 = arith.constant 0 : i32
    %c0_i32_0 = arith.constant 0 : i32
    return %arg0, %c0_i32, %arg1 : i32, i32, i32
  }
  func.func @transform_2(%arg0: i32, %arg1: i32) -> (i32, i32, i32) {
    %c0_i32 = arith.constant 0 : i32
    %c0_i32_0 = arith.constant 0 : i32
    return %arg0, %c0_i32, %arg1 : i32, i32, i32
  }
}

</mosaic_0001>

<bundles_post_ra>
// kernel: tpu_custom_call.1
= control target key start
LH: loop header
LB: loop body
LE: loop exit
PB: predicated region body
PF: predicated region fallthrough
CT: control target
= control target key end

     0   :  { %7 = vsyncpa [#allocation3], 0  ;;  %s894_s0 = inlined_call_operand.vmem [shape: f32[8,108], index: 0, kind: input, shape index: {}]   ;;  %s895_s1 = inlined_call_operand.vmem [shape: f32[2,108,512], index: 1, kind: input, shape index: {}]   ;;  %s896_s2 = inlined_call_operand.hbm [shape: f32[2,8,512], index: 2, kind: output, shape index: {}]  }
   0x1   :  { %9 = vsyncpa [#allocation3 + $0x1], 0  ;;  %s721_s9 = smov 0   ;;  %s723_s10 = smov 0  }
   0x2   :  { %s725_s11 = smov 0   ;;  %s727_s12 = smov 0  }
   0x3   :  { %s729_s13 = smov 0   ;;  %s731_s14 = smov 0  }
   0x4 LB: > { %s486_s15 = sadd.s32 4294967295, %s701_s14   ;;  %s487_s16 = sadd.s32 4294967294, %s701_s14   ;;  %s701_s14 = sphi %s731_s14, %s15_s14   ;;  %s697_s13 = sphi %s729_s13, %s903_s13   ;;  %s693_s12 = sphi %s727_s12, %s902_s12   ;;  %s689_s11 = sphi %s725_s11, %s901_s11   ;;  %s685_s10 = sphi %s723_s10, %s900_s10   ;;  %s681_s9 = sphi %s721_s9, %s899_s9  }
   0x5   : > { %s27_s17 = sadd.s32 1, %s697_s13  ;;  %s85_s18 = sadd.s32 1, %s689_s11 }
   0x6   : > { %p29_p0 = scmp.ge.s32.totalorder %s27_s17, 2  ;;  %p95_p1 = scmp.ne.s32.totalorder %s689_s11, %s685_s10 }
   0x7   : > { %p96_p2 = scmp.eq.s32.totalorder %s486_s15, 1  ;;  %p101_p3 = scmp.ne.s32.totalorder %s685_s10, %s681_s9 }
   0x8   : > { %s905_s17 = smov (%p29_p0, %s27_s17), 0  ;;  %p102_p5 = scmp.eq.s32.totalorder %s487_s16, 1 }
   0x9   : > { %p761_p4 = por %p96_p2, %p95_p1  ;;  %s80_s20 = ssub.s32 %s697_s13, %s905_s17 }
   0xa   : > { %p490_p6 = scmp.ge.s32.totalorder %s701_s14, 1  ;;  %p83_p7 = scmp.eq.s32.totalorder %s80_s20, 0 }
   0xb   : > { %p768_p8 = por %p102_p5, %p101_p3  ;;  %p136_p9 = scmp.lt.s32.totalorder %s701_s14, 3 }
   0xc   : > { %s774_s22 = scalar_select %p83_p7, %s689_s11, %s85_s18  }
   0xd   : > { %p137_p10 = pnand %p490_p6, %p136_p9 }
   0xe   : > { %p163_p11 = scmp.lt.s32.totalorder (!%p137_p10), %s693_s12, 1  ;;  %v703_v0 = vmov (!%p137_p10), 0.0   ;;  %vm234_vm0 = vcmask (!%p137_p10), 1043456   ;;  %vm704_vm1 = vmmov (!%p137_p10), 1   ;;  %vm230_vm3 = vcmask (!%p137_p10), 883712   ;;  %s159_s30 = sand.u32 (!%p137_p10), 1, %s685_s10  }
   0xf   : > { %140 = sbr.rel (%p137_p10) target bundleno = 287 (0x11f), region = 28  ;;  %311 = vmatprep.mubr.f32.mxu0 (!%p137_p10), %v703_v0  ;;  %382 = vmatprep.mubr.f32.mxu1 (!%p137_p10), %v703_v0  ;;  %vm530_vm2 = vmpackc.low (!%p137_p10), %vm234_vm0, %vm704_vm1  ;;  %s491_s3 = sshll.u32 (!%p137_p10), %s159_s30, 5 }
  0x10   : > { %s504_s4 = sshll.u32 (!%p137_p10), %s693_s12, 9  ;;  %s161_s5 = scalar_lea.vmem (!%p137_p10), [#allocation2], %s491_s3 }
  0x11   : > { %s410_s6 = sshll.u32 (!%p137_p10), %s161_s5, 4  ;;  %s847_s15 = scalar_lea.hbm (!%p137_p10), %s896_s2, %s504_s4  ;;  %s849_s6 = int_to_ptr.vmem [resolvable:$true] %s410_s6 }
  0x12   : > { %s623_s16 = scalar_lea.vmem (!%p137_p10), %s849_s6, 512  ;;  %s705_s18 = smov (!%p137_p10), [#allocation2]  }
  0x13   : > { %p624_p12 = scmp.ne.s32.totalorder (!%p137_p10), %s849_s6, %s623_s16  ;;  %s627_s20 = sshll.u32 (!%p137_p10), %s705_s18, 4  ;;  %s628_s20 = int_to_ptr.vmem [resolvable:$false] %s627_s20 }
  0x14   : > { %p630_p1 = scmp.lt.s32.totalorder (!%p137_p10), %s849_s6, %s628_s20 }
  0x15   : > { %p625_p13 = pnand (!%p137_p10), %p624_p12, %p761_p4 }
  0x16   : > { %s164_s23 = scalar_select %p163_p11, %s693_s12, 1 }
  0x17   : > { %s394_s12 = scalar_lea.sflag [#allocation3], %s159_s30  ;;  %p626_p0 = pneg %p625_p13 }
  0x18   : > { %s565_s24 = smul.u32 448, %s164_s23  ;;  %s629_s23 = scalar_lea.vmem %s628_s20, 1024 }
  0x19   : > { %p631_p2 = scmp.lt.s32.totalorder %s629_s23, %s623_s16 }
  0x1a   : > { %s781_s27 = scalar_lea.vmem %s895_s1, %s565_s24 }
  0x1b   : > { %v175_v1 = vld [vmem:[%s781_s27 + $0x8] sm:$0xff]  ;;  %v177_v3 = vld [vmem:[%s781_s27 + $0x18] sm:$0xff]  ;;  %v174_v6 = vld [vmem:[%s781_s27] sm:$0xff]  ;;  %p632_p3 = por %p631_p2, %p630_p1 }
  0x1c   : > { %v179_v2 = vld [vmem:[%s781_s27 + $0x28] sm:$0xff]  ;;  %v181_v5 = vld [vmem:[%s781_s27 + $0x38] sm:$0xff]  ;;  %v178_v7 = vld [vmem:[%s781_s27 + $0x20] sm:$0xff] }
  0x1d   : > { %v505_v4 = vpack.c.bf16 %v179_v2, %v175_v1  ;;  %v535_v8 = vpack.c.bf16 %v181_v5, %v177_v3  ;;  %v507_v9 = vpack.c.bf16 %v178_v7, %v174_v6  ;;  %v176_v10 = vld [vmem:[%s781_s27 + $0x10] sm:$0xff]  ;;  %v183_v12 = vld [vmem:[%s781_s27 + $0x48] sm:$0xff]  ;;  %v185_v15 = vld [vmem:[%s781_s27 + $0x58] sm:$0xff]  ;;  %p633_p5 = pnand %p632_p3, %p626_p0 }
  0x1e   : > { %v180_v11 = vld [vmem:[%s781_s27 + $0x30] sm:$0xff]  ;;  %v187_v14 = vld [vmem:[%s781_s27 + $0x68] sm:$0xff]  ;;  %v189_v16 = vld [vmem:[%s781_s27 + $0x78] sm:$0xff] }
  0x1f   : > { %506 = vmatprep.subr.bf16.mxu0 %v505_v4  ;;  %v537_v13 = vpack.c.bf16 %v180_v11, %v176_v10  ;;  %536 = vmatprep.subr.bf16.mxu1 %v535_v8  ;;  %v509_v17 = vpack.c.bf16 %v187_v14, %v183_v12  ;;  %v539_v18 = vpack.c.bf16 %v189_v16, %v185_v15  ;;  %v182_v19 = vld [vmem:[%s781_s27 + $0x40] sm:$0xff]  ;;  %v184_v21 = vld [vmem:[%s781_s27 + $0x50] sm:$0xff]  ;;  %v191_v24 = vld [vmem:[%s781_s27 + $0x88] sm:$0xff] }
  0x20   : > { %508 = vmatpush1.bf16.msra.mxu0 %v507_v9  ;;  %v186_v20 = vld [vmem:[%s781_s27 + $0x60] sm:$0xff]  ;;  %v188_v23 = vld [vmem:[%s781_s27 + $0x70] sm:$0xff]  ;;  %v195_v25 = vld [vmem:[%s781_s27 + $0xa8] sm:$0xff] }
  0x21   : > { %538 = vmatpush1.bf16.msra.mxu1 %v537_v13  ;;  %v511_v22 = vpack.c.bf16 %v186_v20, %v182_v19  ;;  %510 = vmatprep.subr.bf16.mxu0 %v509_v17  ;;  %v541_v26 = vpack.c.bf16 %v188_v23, %v184_v21  ;;  %v513_v27 = vpack.c.bf16 %v195_v25, %v191_v24  ;;  %v193_v28 = vld [vmem:[%s781_s27 + $0x98] sm:$0xff]  ;;  %v190_v30 = vld [vmem:[%s781_s27 + $0x80] sm:$0xff]  ;;  %v192_v33 = vld [vmem:[%s781_s27 + $0x90] sm:$0xff] }
  0x22   : > { %540 = vmatprep.subr.bf16.mxu1 %v539_v18  ;;  %v197_v29 = vld [vmem:[%s781_s27 + $0xb8] sm:$0xff]  ;;  %v194_v32 = vld [vmem:[%s781_s27 + $0xa0] sm:$0xff]  ;;  %v196_v34 = vld [vmem:[%s781_s27 + $0xb0] sm:$0xff] }
  0x23   : > { %v543_v31 = vpack.c.bf16 %v197_v29, %v193_v28  ;;  %v515_v35 = vpack.c.bf16 %v194_v32, %v190_v30  ;;  %v199_v36 = vld [vmem:[%s781_s27 + $0xc8] sm:$0xff]  ;;  %v201_v38 = vld [vmem:[%s781_s27 + $0xd8] sm:$0xff]  ;;  %v545_v39 = vpack.c.bf16 %v196_v34, %v192_v33  ;;  %v198_v42 = vld [vmem:[%s781_s27 + $0xc0] sm:$0xff] }
  0x24   : > { %512 = vmatpush1.bf16.msra.mxu0 %v511_v22  ;;  %v203_v37 = vld [vmem:[%s781_s27 + $0xe8] sm:$0xff]  ;;  %v205_v41 = vld [vmem:[%s781_s27 + $0xf8] sm:$0xff]  ;;  %v202_v43 = vld [vmem:[%s781_s27 + $0xe0] sm:$0xff] }
  0x25   : > { %542 = vmatpush1.bf16.msra.mxu1 %v541_v26  ;;  %514 = vmatprep.subr.bf16.mxu0 %v513_v27  ;;  %v517_v40 = vpack.c.bf16 %v203_v37, %v199_v36  ;;  %v547_v44 = vpack.c.bf16 %v205_v41, %v201_v38  ;;  %v200_v45 = vld [vmem:[%s781_s27 + $0xd0] sm:$0xff]  ;;  %v207_v47 = vld [vmem:[%s781_s27 + $0x108] sm:$0xff]  ;;  %v209_v49 = vld [vmem:[%s781_s27 + $0x118] sm:$0xff]  ;;  %v519_v51 = vpack.c.bf16 %v202_v43, %v198_v42 }
  0x26   : > { %544 = vmatprep.subr.bf16.mxu1 %v543_v31  ;;  %v204_v46 = vld [vmem:[%s781_s27 + $0xf0] sm:$0xff]  ;;  %v211_v48 = vld [vmem:[%s781_s27 + $0x128] sm:$0xff]  ;;  %v213_v50 = vld [vmem:[%s781_s27 + $0x138] sm:$0xff] }
  0x27   : > { %v549_v52 = vpack.c.bf16 %v204_v46, %v200_v45  ;;  %v521_v53 = vpack.c.bf16 %v211_v48, %v207_v47  ;;  %v206_v54 = vld [vmem:[%s781_s27 + $0x100] sm:$0xff]  ;;  %v208_v56 = vld [vmem:[%s781_s27 + $0x110] sm:$0xff]  ;;  %v551_v57 = vpack.c.bf16 %v213_v50, %v209_v49  ;;  %v215_v59 = vld [vmem:[%s781_s27 + $0x148] sm:$0xff] }
  0x28   : > { %516 = vmatpush1.bf16.msra.mxu0 %v515_v35  ;;  %v210_v55 = vld [vmem:[%s781_s27 + $0x120] sm:$0xff]  ;;  %v212_v58 = vld [vmem:[%s781_s27 + $0x130] sm:$0xff]  ;;  %v219_v60 = vld [vmem:[%s781_s27 + $0x168] sm:$0xff] }
  0x29   : > { %546 = vmatpush1.bf16.msra.mxu1 %v545_v39  ;;  %518 = vmatprep.subr.bf16.mxu0 %v517_v40  ;;  %v217_v61 = vld [vmem:[%s781_s27 + $0x158] sm:$0xff]  ;;  %v523_v63 = vpack.c.bf16 %v210_v55, %v206_v54  ;;  %v553_v0 = vpack.c.bf16 %v212_v58, %v208_v56  ;;  %v525_v1 = vpack.c.bf16 %v219_v60, %v215_v59  ;;  %v214_v2 = vld [vmem:[%s781_s27 + $0x140] sm:$0xff]  ;;  %v216_v4 = vld [vmem:[%s781_s27 + $0x150] sm:$0xff] }
  0x2a   : > { %548 = vmatprep.subr.bf16.mxu1 %v547_v44  ;;  %v221_v62 = vld [vmem:[%s781_s27 + $0x178] sm:$0xff]  ;;  %v218_v3 = vld [vmem:[%s781_s27 + $0x160] sm:$0xff]  ;;  %v220_v6 = vld [vmem:[%s781_s27 + $0x170] sm:$0xff] }
  0x2b   : > { %v555_v5 = vpack.c.bf16 %v221_v62, %v217_v61  ;;  %v223_v7 = vld [vmem:[%s781_s27 + $0x188] sm:$0xff]  ;;  %v225_v9 = vld [vmem:[%s781_s27 + $0x198] sm:$0xff]  ;;  %v527_v11 = vpack.c.bf16 %v218_v3, %v214_v2  ;;  %v557_v12 = vpack.c.bf16 %v220_v6, %v216_v4  ;;  %v222_v14 = vld [vmem:[%s781_s27 + $0x180] sm:$0xff] }
  0x2c   : > { %520 = vmatpush1.bf16.msra.mxu0 %v519_v51  ;;  %v227_v8 = vld [vmem:[%s781_s27 + $0x1a8] sm:$0xf]  ;;  %v229_v10 = vld [vmem:[%s781_s27 + $0x1b8] sm:$0xf]  ;;  %v226_v15 = vld [vmem:[%s781_s27 + $0x1a0] sm:$0xf] }
  0x2d   : > { %550 = vmatpush1.bf16.msra.mxu1 %v549_v52  ;;  %522 = vmatprep.subr.bf16.mxu0 %v521_v53  ;;  %v529_v13 = vpack.c.bf16 %v227_v8, %v223_v7  ;;  %v559_v16 = vpack.c.bf16 %v229_v10, %v225_v9  ;;  %v224_v17 = vld [vmem:[%s781_s27 + $0x190] sm:$0xff]  ;;  %v532_v19 = vpack.c.bf16 %v226_v15, %v222_v14  ;;  %v173_v21 = vld [vmem:[%s894_s0] sm:$0xff] }
  0x2e   : > { %552 = vmatprep.subr.bf16.mxu1 %v551_v57  ;;  %v228_v18 = vld [vmem:[%s781_s27 + $0x1b0] sm:$0xf] }
  0x2f   : > { %v562_v20 = vpack.c.bf16 %v228_v18, %v224_v17 }
  0x30   : > { %524 = vmatpush1.bf16.msra.mxu0 %v523_v63 }
  0x31   : > { %554 = vmatpush1.bf16.msra.mxu1 %v553_v0  ;;  %526 = vmatprep.subr.bf16.mxu0 %v525_v1 }
  0x32   : > { %556 = vmatprep.subr.bf16.mxu1 %v555_v5 }
  0x34   : > { %528 = vmatpush1.bf16.msra.mxu0 %v527_v11 }
  0x35   : > { %558 = vmatpush1.bf16.msra.mxu1 %v557_v12  ;;  %531 = vmatprep.subr.msk.bf16.mxu0 %vm530_vm2, %v529_v13 }
  0x36   : > { %561 = vmatprep.subr.msk.bf16.mxu1 %vm530_vm2, %v559_v16 }
  0x38   : > { %534 = vmatpush1.bf16.msk.msra.mxu0 %vm530_vm2, %v532_v19 }
  0x39   : > { %564 = vmatpush1.bf16.msk.msra.mxu1 %vm530_vm2, %v562_v20 }
  0x3b   : > { %495 = vmatmul.mubr.msk.f32.vlgmr.msra.gmra.mrb[0].mxu0 %vm230_vm3, %v173_v21 }
  0x3c   : > { %498 = vmatmul.mubr.msk.f32.vlgmr.msra.gmra.mrb[0].mxu1 %vm230_vm3, %v173_v21 }
 0x10e   : > { %v313_v22 = vpop.f32.mrb[0].mxu0 }
 0x10f   : > { %389 = vst [vmem:[%s161_s5] sm:$0xff] %v313_v22  ;;  %v384_v23 = vpop.f32.mrb[0].mxu1  ;;  %v315_v24 = vpop.f32.mrb[1].mxu0 }
 0x110   : > { %391 = vst [vmem:[%s161_s5 + $0x10] sm:$0xff] %v384_v23  ;;  %390 = vst [vmem:[%s161_s5 + $0x8] sm:$0xff] %v315_v24  ;;  %v386_v25 = vpop.f32.mrb[1].mxu1 }
 0x111   : > { %392 = vst [vmem:[%s161_s5 + $0x18] sm:$0xff] %v386_v25 }
 0x112   : > { %636 = shalt.err (!%p633_p5)
}
 0x113   : > { %s637_s24 = scalar_lea.hbm %s847_s15, 512  ;;  %s641_s27 = scalar_lea.hbm %s896_s2, 1024 }
 0x114   : > { %p638_p6 = scmp.ne.s32.totalorder %s847_s15, %s637_s24  ;;  %p642_p10 = scmp.lt.u32.totalorder %s847_s15, %s896_s2 }
 0x115   : > { %p643_p11 = scmp.lt.u32.totalorder %s641_s27, %s637_s24  ;;  %p645_p13 = scmp.lt.u32.totalorder %s637_s24, %s847_s15 }
 0x116   : > { %p639_p7 = pnand %p638_p6, %p761_p4 }
 0x117   : > { %p644_p12 = por %p643_p11, %p642_p10 }
 0x118   : > { %p640_p9 = pneg %p639_p7 }
 0x119   : > { %p646_p0 = por %p645_p13, %p644_p12 }
 0x11b   : > { %p647_p1 = pnand %p646_p0, %p640_p9 }
 0x11d   : > { %650 = shalt.err (!%p647_p1)
}
 0x11e   : > { %566 = dma.vmem_to_hbm [thread:$0]  (%p761_p4), %s849_s6, 512, %s847_s15, %s394_s12  }
 0x11f PF: > { %p572_p2 = scmp.ge.s32.totalorder %s701_s14, 2  ;;  %s422_s30 = sand.u32 1, %s681_s9  }
 0x120   : > { %s423_s3 = scalar_lea.sflag [#allocation3], %s422_s30 }
 0x121   : > { %p569_p3 = pnand %p572_p2, %p768_p8 }
 0x123   : > { %676 = dma.done.wait (!%p569_p3), %s423_s3, 512  }
 0x124   : > { %678 = vsyncadd (!%p569_p3), %s423_s3, 4294966784  ;;  %s15_s14 = sadd.s32 1, %s701_s14   ;;  %s899_s9 = smov %s685_s10 }
 0x125   : > { %p12_p5 = scmp.ge.s32.totalorder %s15_s14, 4   ;;  %s900_s10 = smov %s689_s11 }
 0x126   : > { %s901_s11 = smov %s774_s22  ;;  %s902_s12 = smov %s697_s13 }
 0x127   : > { %s903_s13 = smov %s905_s17  ;;  %14 = sbr.rel (!%p12_p5) target bundleno = 4 (0x4), region = 63 }
 0x12e   :  { %428 = vsyncpa [#allocation3], 1 }
 0x12f   :  { %430 = vsyncpa [#allocation3 + $0x1], 1 }

</bundles_post_ra>
